<compile_context>
chip_gen: v7x
topology: tpu7x:2x2x1
jax: 0.10.0
libtpu: 0.0.40
codegen_flags: <defaults>
</compile_context>

<pallas_src>
import functools

import jax
import jax.numpy as jnp
from jax.experimental import pallas as pl
from jax.experimental.pallas import tpu as pltpu


def _cdiv(a, b):
    return (a + b - 1) // b


def _round_up(x, m):
    return _cdiv(x, m) * m


def _device_kind():
    try:
        return jax.devices()[0].device_kind.lower()
    except Exception:  # pragma: no cover - defensive; default to 1-TC sizing
        return ""


def _label_smoothing_kernel(pred_ref, tgt_ref, out_ref, acc_ref, *,
                            classes, smoothing, ignore_index):
    i = pl.program_id(1)          # sequential tile index within this core

    @pl.when(i == 0)
    def _():
        acc_ref[...] = jnp.zeros_like(acc_ref)

    pred = pred_ref[...].astype(jnp.float32)                       # (TM, C)
    tgt = tgt_ref[...]                                             # (TM, 1) i32

    confidence = 1.0 - smoothing
    smooth_val = smoothing / (classes - 1)

    # Stable log-softmax pieces; row reductions taken on pred directly so only
    # the exp needs the (pred - m) slab; everything kept is (TM, 1).
    m = jnp.max(pred, axis=-1, keepdims=True)                          # (TM,1)
    lse = jnp.log(jnp.sum(jnp.exp(pred - m), axis=-1, keepdims=True))  # (TM,1)
    sum_pred = jnp.sum(pred, axis=-1, keepdims=True)                   # (TM,1)
    # sum_c logp = sum_c pred - C*(m + lse)
    sum_logp = sum_pred - jnp.float32(classes) * (m + lse)             # (TM,1)

    # logp at the target class: (1, C) iota broadcast against (TM, 1) target.
    cls_idx = jax.lax.broadcasted_iota(jnp.int32, (1, classes), 1)     # (1, C)
    pred_tgt = jnp.sum(jnp.where(cls_idx == tgt, pred, 0.0),
                       axis=-1, keepdims=True)                         # (TM,1)
    logp_tgt = pred_tgt - m - lse                                      # (TM,1)

    per_row = -(jnp.float32(smooth_val) * sum_logp
                + jnp.float32(confidence - smooth_val) * logp_tgt)
    # masked_fill_ of the whole row -> row contributes 0 (padding rows too).
    per_row = jnp.where(tgt == ignore_index, jnp.float32(0.0), per_row)

    acc_ref[...] += per_row                                            # (TM,1)

    @pl.when(i == pl.num_programs(1) - 1)
    def _():
        out_ref[0] = jnp.sum(acc_ref[...], axis=0, keepdims=True)      # (1, 1)


def label_smoothing_loss(pred, target, *, classes, smoothing=0.1,
                         ignore_index=-100, tm=None):
    """pred: (N, C) float (f32 or bf16), target: (N,) int. Scalar f32 loss."""
    N, C = pred.shape
    assert C == classes

    kind = _device_kind()
    is_v7x = "v7" in kind
    # v7x: 2 TCs/chip but only 64 MiB VMEM/TC and ~2.3x HBM BW -> 2-way split,
    # somewhat smaller slabs, tighter vmem limit.  v5e/v6e: 1 TC, 128 MiB VMEM.
    num_cores = 2 if is_v7x else 1
    slab_bytes = (4 if is_v7x else 8) * 1024 * 1024
    vmem_limit = (48 if is_v7x else 96) * 1024 * 1024

    itemsize = jnp.dtype(pred.dtype).itemsize
    align = {4: 8, 2: 16, 1: 32}.get(itemsize, 8)   # sublane packing per dtype

    if tm is None:
        # Several MiB of pred (in its own dtype) per grid step so the ~0.35 us
        # per-step overhead is amortized away; HBM DMA is the binding cost.
        tm = max(align, slab_bytes // (itemsize * C))
    tm = _round_up(tm, align)
    # Don't tile past what each core actually needs.
    tm = min(tm, _round_up(_cdiv(N, num_cores), align))

    n_pad = _round_up(N, tm * num_cores)
    n_tiles = n_pad // tm
    tiles_per_core = n_tiles // num_cores

    tgt2d = target.astype(jnp.int32).reshape(N, 1)
    if n_pad != N:
        pred = jnp.pad(pred, ((0, n_pad - N), (0, 0)))
        tgt2d = jnp.pad(tgt2d, ((0, n_pad - N), (0, 0)),
                        constant_values=ignore_index)

    kernel = functools.partial(
        _label_smoothing_kernel,
        classes=classes, smoothing=smoothing, ignore_index=ignore_index)

    partials = pl.pallas_call(
        kernel,
        out_shape=jax.ShapeDtypeStruct((num_cores, 1, 1), jnp.float32),
        grid_spec=pltpu.PrefetchScalarGridSpec(
            num_scalar_prefetch=0,
            grid=(num_cores, tiles_per_core),
            in_specs=[
                # pred: one (tm, C) row-tile per grid step
                pl.BlockSpec((tm, C),
                             lambda c, i: (c * tiles_per_core + i, 0)),
                # target: matching (tm, 1) row-tile (tiny DMA, pipelined)
                pl.BlockSpec((tm, 1),
                             lambda c, i: (c * tiles_per_core + i, 0)),
            ],
            # one (1,1,1) partial per outer (core) index
            out_specs=pl.BlockSpec((1, 1, 1), lambda c, i: (c, 0, 0)),
            scratch_shapes=[pltpu.VMEM((tm, 1), jnp.float32)],
        ),
        compiler_params=pltpu.CompilerParams(
            dimension_semantics=("parallel", "arbitrary"),
            vmem_limit_bytes=vmem_limit),
    )(pred, tgt2d)

    # mean over the ORIGINAL N rows (padded rows contribute exactly 0).
    return jnp.sum(partials) / jnp.float32(N)


def _reference(pred, target, *, classes, smoothing=0.1, ignore_index=-100):
    logp = jax.nn.log_softmax(pred.astype(jnp.float32), axis=-1)
    confidence = 1.0 - smoothing
    smooth_val = smoothing / (classes - 1)
    cls_idx = jnp.arange(classes)[None, :]
    tgt = target[:, None]
    true_dist = jnp.where(cls_idx == tgt, confidence, smooth_val)
    true_dist = jnp.where(tgt == ignore_index, 0.0, true_dist)
    return jnp.mean(jnp.sum(-true_dist * logp, axis=-1))


if __name__ == "__main__":
    key = jax.random.PRNGKey(0)

    # Case 1: small f32, single tile / auto tiling.
    N, C = 16, 128
    k1, k2 = jax.random.split(key)
    pred = jax.random.normal(k1, (N, C), dtype=jnp.float32)
    target = jax.random.randint(k2, (N,), 0, C, dtype=jnp.int32)
    target = target.at[3].set(-100).at[11].set(-100)   # ignored rows

    loss = label_smoothing_loss(pred, target, classes=C, smoothing=0.1,
                                ignore_index=-100)
    jax.block_until_ready(loss)
    ref = _reference(pred, target, classes=C, smoothing=0.1, ignore_index=-100)
    assert jnp.allclose(loss, ref, atol=1e-5, rtol=1e-5), (loss, ref)

    # Case 2: non-multiple N -> padding, explicit tm -> multi-tile grid path.
    N2, C2 = 61, 128
    k3, k4 = jax.random.split(k2)
    pred2 = jax.random.normal(k3, (N2, C2), dtype=jnp.float32)
    target2 = jax.random.randint(k4, (N2,), 0, C2, dtype=jnp.int32)
    target2 = target2.at[0].set(-100).at[17].set(-100)

    loss2 = label_smoothing_loss(pred2, target2, classes=C2, smoothing=0.1,
                                 ignore_index=-100, tm=8)
    jax.block_until_ready(loss2)
    ref2 = _reference(pred2, target2, classes=C2, smoothing=0.1,
                      ignore_index=-100)
    assert jnp.allclose(loss2, ref2, atol=1e-5, rtol=1e-5), (loss2, ref2)

    # Case 3: bf16 pred (half the HBM bytes), 16-sublane aligned tiles.
    N3, C3 = 40, 256
    k5, k6 = jax.random.split(k4)
    pred3 = jax.random.normal(k5, (N3, C3), dtype=jnp.float32).astype(
        jnp.bfloat16)
    target3 = jax.random.randint(k6, (N3,), 0, C3, dtype=jnp.int32)
    target3 = target3.at[5].set(-100)

    loss3 = label_smoothing_loss(pred3, target3, classes=C3, smoothing=0.1,
                                 ignore_index=-100)
    jax.block_until_ready(loss3)
    ref3 = _reference(pred3, target3, classes=C3, smoothing=0.1,
                      ignore_index=-100)
    assert jnp.allclose(loss3, ref3, atol=1e-4, rtol=1e-4), (loss3, ref3)

    print("KERNEL_OK")
</pallas_src>

<mosaic_0001>
module attributes {stable_mosaic.version = 11 : i64} {
  func.func @_label_smoothing_kernel(%arg0: i32, %arg1: i32, %arg2: memref<16x128xf32, #tpu.memory_space<vmem>>, %arg3: memref<16x1xi32, #tpu.memory_space<vmem>>, %arg4: memref<1x1x1xf32, #tpu.memory_space<vmem>>, %arg5: memref<16x1xf32, #tpu.memory_space<vmem>>) attributes {dimension_semantics = [#tpu.dimension_semantics<parallel>, #tpu.dimension_semantics<arbitrary>], iteration_bounds = array<i64: 1, 1>, scalar_prefetch = 0 : i64, scratch_operands = 1 : i64, tpu.core_type = #tpu.core_type<tc>, window_params = [{transform_indices = @transform_0, window_bounds = array<i64: 16, 128>}, {transform_indices = @transform_1, window_bounds = array<i64: 16, 1>}, {transform_indices = @transform_2, window_bounds = array<i64: 1, 1, 1>}]} {
    %c0_i32 = arith.constant 0 : i32
    %0 = arith.cmpi eq, %arg1, %c0_i32 : i32
    %1 = arith.extui %0 : i1 to i32
    %c0_i32_0 = arith.constant 0 : i32
    %2 = arith.cmpi ne, %1, %c0_i32_0 : i32
    scf.if %2 {
      %cst_19 = arith.constant 0.000000e+00 : f32
      %46 = vector.broadcast %cst_19 : f32 to vector<16x1xf32>
      %c0_20 = arith.constant 0 : index
      %c0_21 = arith.constant 0 : index
      %47 = vector.load %arg5[%c0_20, %c0_21] : memref<16x1xf32, #tpu.memory_space<vmem>>, vector<16x1xf32>
      tpu.vector_store %arg5[%c0_20, %c0_21], %46 {strides = array<i32>} : memref<16x1xf32, #tpu.memory_space<vmem>>, vector<16x1xf32>,
    } else {
    }
    %c0 = arith.constant 0 : index
    %c0_1 = arith.constant 0 : index
    %3 = vector.load %arg2[%c0, %c0_1] : memref<16x128xf32, #tpu.memory_space<vmem>>, vector<16x128xf32>
    %c0_2 = arith.constant 0 : index
    %c0_3 = arith.constant 0 : index
    %4 = vector.load %arg3[%c0_2, %c0_3] : memref<16x1xi32, #tpu.memory_space<vmem>>, vector<16x1xi32>
    %cst = arith.constant dense<0xFF800000> : vector<16xf32>
    %5 = vector.multi_reduction <maximumf>, %3, %cst [1] : vector<16x128xf32> to vector<16xf32>
    %6 = vector.shape_cast %5 : vector<16xf32> to vector<16x1xf32>
    %7 = vector.broadcast %6 : vector<16x1xf32> to vector<16x128xf32>
    %8 = arith.subf %3, %7 : vector<16x128xf32>
    %9 = math.exp %8 : vector<16x128xf32>
    %cst_4 = arith.constant dense<0.000000e+00> : vector<16xf32>
    %10 = vector.multi_reduction <add>, %9, %cst_4 [1] : vector<16x128xf32> to vector<16xf32>
    %11 = vector.shape_cast %10 : vector<16xf32> to vector<16x1xf32>
    %12 = math.log %11 : vector<16x1xf32>
    %cst_5 = arith.constant dense<0.000000e+00> : vector<16xf32>
    %13 = vector.multi_reduction <add>, %3, %cst_5 [1] : vector<16x128xf32> to vector<16xf32>
    %14 = vector.shape_cast %13 : vector<16xf32> to vector<16x1xf32>
    %15 = arith.addf %6, %12 : vector<16x1xf32>
    %cst_6 = arith.constant 1.280000e+02 : f32
    %16 = vector.broadcast %cst_6 : f32 to vector<16x1xf32>
    %17 = arith.mulf %16, %15 : vector<16x1xf32>
    %18 = arith.subf %14, %17 : vector<16x1xf32>
    %19 = tpu.iota {dimensions = array<i32: 1>} : vector<1x128xi32>
    %20 = vector.broadcast %19 : vector<1x128xi32> to vector<16x128xi32>
    %21 = vector.broadcast %4 : vector<16x1xi32> to vector<16x128xi32>
    %22 = arith.cmpi eq, %20, %21 : vector<16x128xi32>
    %cst_7 = arith.constant 0.000000e+00 : f32
    %23 = vector.broadcast %cst_7 : f32 to vector<16x128xf32>
    %24 = arith.select %22, %3, %23 : vector<16x128xi1>, vector<16x128xf32>
    %cst_8 = arith.constant dense<0.000000e+00> : vector<16xf32>
    %25 = vector.multi_reduction <add>, %24, %cst_8 [1] : vector<16x128xf32> to vector<16xf32>
    %26 = vector.shape_cast %25 : vector<16xf32> to vector<16x1xf32>
    %27 = arith.subf %26, %6 : vector<16x1xf32>
    %28 = arith.subf %27, %12 : vector<16x1xf32>
    %cst_9 = arith.constant 7.87401571E-4 : f32
    %29 = vector.broadcast %cst_9 : f32 to vector<16x1xf32>
    %30 = arith.mulf %29, %18 : vector<16x1xf32>
    %cst_10 = arith.constant 0.899212599 : f32
    %31 = vector.broadcast %cst_10 : f32 to vector<16x1xf32>
    %32 = arith.mulf %31, %28 : vector<16x1xf32>
    %33 = arith.addf %30, %32 : vector<16x1xf32>
    %cst_11 = arith.constant 0.000000e+00 : f32
    %34 = vector.broadcast %cst_11 : f32 to vector<16x1xf32>
    %35 = arith.subf %34, %33 : vector<16x1xf32>
    %c-100_i32 = arith.constant -100 : i32
    %36 = vector.broadcast %c-100_i32 : i32 to vector<16x1xi32>
    %37 = arith.cmpi eq, %4, %36 : vector<16x1xi32>
    %cst_12 = arith.constant 0.000000e+00 : f32
    %38 = vector.broadcast %cst_12 : f32 to vector<16x1xf32>
    %39 = arith.select %37, %38, %35 : vector<16x1xi1>, vector<16x1xf32>
    %c0_13 = arith.constant 0 : index
    %c0_14 = arith.constant 0 : index
    %40 = vector.load %arg5[%c0_13, %c0_14] : memref<16x1xf32, #tpu.memory_space<vmem>>, vector<16x1xf32>
    %41 = arith.addf %40, %39 : vector<16x1xf32>
    %c0_15 = arith.constant 0 : index
    %c0_16 = arith.constant 0 : index
    %42 = vector.load %arg5[%c0_15, %c0_16] : memref<16x1xf32, #tpu.memory_space<vmem>>, vector<16x1xf32>
    tpu.vector_store %arg5[%c0_15, %c0_16], %41 {strides = array<i32>} : memref<16x1xf32, #tpu.memory_space<vmem>>, vector<16x1xf32>,
    %c0_i32_17 = arith.constant 0 : i32
    %43 = arith.cmpi eq, %arg1, %c0_i32_17 : i32
    %44 = arith.extui %43 : i1 to i32
    %c0_i32_18 = arith.constant 0 : i32
    %45 = arith.cmpi ne, %44, %c0_i32_18 : i32
    scf.if %45 {
      %c0_19 = arith.constant 0 : index
      %c0_20 = arith.constant 0 : index
      %46 = vector.load %arg5[%c0_19, %c0_20] : memref<16x1xf32, #tpu.memory_space<vmem>>, vector<16x1xf32>
      %cst_21 = arith.constant dense<0.000000e+00> : vector<1xf32>
      %47 = vector.multi_reduction <add>, %46, %cst_21 [0] : vector<16x1xf32> to vector<1xf32>
      %48 = vector.shape_cast %47 : vector<1xf32> to vector<1x1xf32>
      %c0_22 = arith.constant 0 : index
      %c0_23 = arith.constant 0 : index
      %c0_24 = arith.constant 0 : index
      %49 = vector.load %arg4[%c0_22, %c0_23, %c0_24] : memref<1x1x1xf32, #tpu.memory_space<vmem>>, vector<1x1x1xf32>
      %50 = vector.shape_cast %49 : vector<1x1x1xf32> to vector<1x1xf32>
      %51 = vector.shape_cast %48 : vector<1x1xf32> to vector<1x1x1xf32>
      tpu.vector_store %arg4[%c0_22, %c0_23, %c0_24], %51 {strides = array<i32>} : memref<1x1x1xf32, #tpu.memory_space<vmem>>, vector<1x1x1xf32>,
    } else {
    }
    return
  }
  func.func @transform_0(%arg0: i32, %arg1: i32) -> (i32, i32) {
    %c1_i32 = arith.constant 1 : i32
    %0 = arith.muli %arg0, %c1_i32 : i32
    %1 = arith.addi %0, %arg1 : i32
    %c0_i32 = arith.constant 0 : i32
    %c0_i32_0 = arith.constant 0 : i32
    return %1, %c0_i32 : i32, i32
  }
  func.func @transform_1(%arg0: i32, %arg1: i32) -> (i32, i32) {
    %c1_i32 = arith.constant 1 : i32
    %0 = arith.muli %arg0, %c1_i32 : i32
    %1 = arith.addi %0, %arg1 : i32
    %c0_i32 = arith.constant 0 : i32
    %c0_i32_0 = arith.constant 0 : i32
    return %1, %c0_i32 : i32, i32
  }
  func.func @transform_2(%arg0: i32, %arg1: i32) -> (i32, i32, i32) {
    %c0_i32 = arith.constant 0 : i32
    %c0_i32_0 = arith.constant 0 : i32
    %c0_i32_1 = arith.constant 0 : i32
    return %arg0, %c0_i32, %c0_i32_0 : i32, i32, i32
  }
}

</mosaic_0001>

<bundles_post_ra>
// kernel: tpu_custom_call.1
= control target key start
LH: loop header
LB: loop body
LE: loop exit
PB: predicated region body
PF: predicated region fallthrough
CT: control target
= control target key end

     0   :  { %7 = vsyncpa [#allocation4], 0  ;;  %s323_s0 = inlined_call_operand.hbm [shape: f32[16,128], index: 0, kind: input, shape index: {}]   ;;  %s324_s1 = inlined_call_operand.hbm [shape: s32[16,1], index: 1, kind: input, shape index: {}]   ;;  %s325_s2 = inlined_call_operand.hbm [shape: f32[1,1,1], index: 2, kind: output, shape index: {}]  }
   0x1   :  { %8 = vsyncpa [#allocation7], 0 }
   0x2   :  { %9 = vsyncpa [#allocation5], 0  ;;  %s251_s9 = smov [#allocation3]   ;;  %s179_s13 = scalar_lea.hbm %s323_s0, 256 }
   0x3   :  { %s19_s10 = sshll.u32 %s251_s9, 4  ;;  %p180_p0 = scmp.ne.s32.totalorder %s323_s0, %s179_s13  ;;  %s20_s10 = int_to_ptr.vmem [resolvable:$true] %s19_s10 }
   0x4   :  { %p183_p1 = scmp.lt.u32.totalorder %s179_s13, %s323_s0 }
   0x6   :  { %p185_p2 = pnand %p183_p1, %p180_p0 }
   0x8   :  { %188 = shalt.err (!%p185_p2)
}
   0x9   :  { %s189_s18 = scalar_lea.vmem %s20_s10, 256  ;;  %p194_p4 = scmp.lt.s32.totalorder %s20_s10, %s20_s10 }
   0xa   :  { %p190_p3 = scmp.ne.s32.totalorder %s20_s10, %s189_s18  ;;  %p195_p5 = scmp.lt.s32.totalorder %s189_s18, %s189_s18 }
   0xc   :  { %p196_p6 = por %p195_p5, %p194_p4 }
   0xe   :  { %p197_p7 = pnand %p196_p6, %p190_p3 }
  0x10   :  { %200 = shalt.err (!%p197_p7)
}
  0x11   :  { %s252_s19 = smov 128   ;;  %s253_s20 = smov 8  }
  0x12   :  { %25 = dma.hbm_to_vmem [thread:$0]  %s323_s0, 256, %s20_s10, [#allocation4], %s252_s19, %s252_s19, %s253_s20  }
  0x13   :  { %s254_s23 = smov [#allocation6]   ;;  %s201_s27 = scalar_lea.hbm %s324_s1, 256 }
  0x14   :  { %s35_s24 = sshll.u32 %s254_s23, 4  ;;  %p202_p8 = scmp.ne.s32.totalorder %s324_s1, %s201_s27  ;;  %s36_s24 = int_to_ptr.vmem [resolvable:$true] %s35_s24 }
  0x15   :  { %p205_p9 = scmp.lt.u32.totalorder %s201_s27, %s324_s1 }
  0x17   :  { %p207_p10 = pnand %p205_p9, %p202_p8 }
  0x19   :  { %210 = shalt.err (!%p207_p10)
}
  0x1a   :  { %s211_s4 = scalar_lea.vmem %s36_s24, 256  ;;  %p216_p12 = scmp.lt.s32.totalorder %s36_s24, %s36_s24 }
  0x1b   :  { %p212_p11 = scmp.ne.s32.totalorder %s36_s24, %s211_s4  ;;  %p217_p13 = scmp.lt.s32.totalorder %s211_s4, %s211_s4 }
  0x1d   :  { %p218_p0 = por %p217_p13, %p216_p12 }
  0x1f   :  { %p219_p1 = pnand %p218_p0, %p212_p11 }
  0x21   :  { %222 = shalt.err (!%p219_p1)
}
  0x22   :  { %41 = dma.hbm_to_vmem [thread:$0]  %s324_s1, 256, %s36_s24, [#allocation7], %s252_s19, %s252_s19, %s253_s20  }
  0x23   :  { %245 = dma.done.wait [#allocation4], 256  }
  0x24   :  { %246 = vsyncadd [#allocation4], 4294967040 }
  0x25   :  { %247 = dma.done.wait [#allocation7], 256  }
  0x26   :  { %248 = vsyncadd [#allocation7], 4294967040  ;;  %v255_v0 = vmov 0   ;;  %v59_v1 = vld [vmem:[#allocation3] sm:$0xff]  ;;  %v297_v2 = vld [vmem:[#allocation6] sm:$0xff]  ;;  %v91_v10 = vlaneseq  ;;  %vm56_vm2 = vcmask 7168  }
  0x27   :  { %169 = vset.pattern.permute.xlu1 %v255_v0  ;;  %170 = vset.pattern.permute.xlu0 %v255_v0  ;;  %v60_v3 = vld [vmem:[#allocation3 + $0x8] sm:$0xff]  ;;  %v300_v4 = vld [vmem:[#allocation6 + $0x8] sm:$0xff]  ;;  %v256_v19 = vmov 0.0   ;;  %vm119_vm3 = vcmp.eq.s32.totalorder %v297_v2, 4294967196  ;;  %s257_s1 = smov [#allocation8]   ;;  %vm144_vm5 = vcmask 0  }
  0x28   :  { %63 = vmax.xlane.f32.xlu0 %v59_v1  ;;  %94 = vperm.xlu1 %169, %v297_v2   ;;  %v92_v13 = vand.u32 127, %v91_v10  ;;  %57 = vst.msk [vmem:[#allocation2] sm:$0xff] %vm56_vm2, %v256_v19  ;;  %58 = vst.msk [vmem:[#allocation2 + $0x8] sm:$0xff] %vm56_vm2, %v256_v19  ;;  %vm120_vm4 = vcmp.eq.s32.totalorder %v300_v4, 4294967196  ;;  %s152_s6 = sshll.u32 %s257_s1, 4  ;;  %s153_s6 = int_to_ptr.vmem [resolvable:$true] %s152_s6 }
  0x29   :  { %s223_s7 = scalar_lea.vmem %s153_s6, 16  ;;  %s227_s8 = scalar_lea.vmem %s153_s6, 32 }
  0x2a   :  { %p224_p2 = scmp.ne.s32.totalorder %s153_s6, %s223_s7  ;;  %p228_p3 = scmp.lt.s32.totalorder %s153_s6, %s153_s6 }
  0x2b   :  { %p229_p4 = scmp.lt.s32.totalorder %s227_s8, %s223_s7 }
  0x2c   :  { %65 = vmax.xlane.f32.xlu0 %v60_v3  ;;  %97 = vperm.xlu1 %169, %v300_v4  }
  0x2d   :  { %p230_p5 = por %p229_p4, %p228_p3 }
  0x2f   :  { %v123_v45 = vld [vmem:[#allocation2] sm:$0xff]  ;;  %v124_v51 = vld [vmem:[#allocation2 + $0x8] sm:$0xff]  ;;  %p231_p6 = pnand %p230_p5, %p224_p2 }
  0xa7   :  { %v95_v12 = vpop.permute.xlu1 %94 }
  0xa8   :  { %vm99_vm0 = vcmp.eq.s32.totalorder %v92_v13, %v95_v12 }
  0xa9   :  { %v101_v16 = vsel %vm99_vm0, %v59_v1, 0.0 }
  0xab   :  { %v98_v15 = vpop.permute.xlu1 %97 }
  0xac   :  { %vm100_vm1 = vcmp.eq.s32.totalorder %v92_v13, %v98_v15 }
  0xad   :  { %v102_v18 = vsel %vm100_vm1, %v60_v3, 0.0 }
  0xb5   :  { %v64_v5 = vpop.xlane.xlu0 %63 }
  0xb6   :  { %v67_v6 = vsub.f32 %v59_v1, %v64_v5 }
  0xb8   :  { %v69_v7 = vmul.f32 1.442695, %v67_v6 }
  0xb9   :  { %v66_v8 = vpop.xlane.xlu0 %65 }
  0xba   :  { %171 = vpow2.f32 %v69_v7  ;;  %v68_v9 = vsub.f32 %v60_v3, %v66_v8 }
  0xbc   :  { %v71_v11 = vmul.f32 1.442695, %v68_v9 }
  0xbe   :  { %173 = vpow2.f32 %v71_v11 }
  0xc4   :  { %v172_v14 = vpop.eup %171 }
  0xc5   :  { %73 = vadd.xlane.f32.xlu0 %v172_v14 }
  0xc8   :  { %v174_v17 = vpop.eup %173 }
  0xc9   :  { %75 = vadd.xlane.f32.xlu1 %v174_v17  ;;  %103 = vadd.xlane.f32.xlu0 %v101_v16 }
  0xcd   :  { %105 = vadd.xlane.f32.xlu0 %v102_v18 }
  0xd1   :  { %81 = vadd.xlane.f32.xlu0 %v59_v1 }
  0xd5   :  { %83 = vadd.xlane.f32.xlu0 %v60_v3 }
 0x152   :  { %v74_v20 = vpop.xlane.xlu0 %73 }
 0x153   :  { %175 = vlog2.f32 %v74_v20 }
 0x156   :  { %v76_v21 = vpop.xlane.xlu1 %75  ;;  %v104_v22 = vpop.xlane.xlu0 %103 }
 0x157   :  { %177 = vlog2.f32 %v76_v21  ;;  %v107_v27 = vsub.f32 %v104_v22, %v64_v5 }
 0x15a   :  { %v106_v23 = vpop.xlane.xlu0 %105 }
 0x15b   :  { %v108_v33 = vsub.f32 %v106_v23, %v66_v8 }
 0x15d   :  { %v176_v24 = vpop.eup %175 }
 0x15e   :  { %v78_v25 = vmul.f32 0.6931472, %v176_v24  ;;  %v82_v26 = vpop.xlane.xlu0 %81 }
 0x160   :  { %v85_v28 = vadd.f32 %v78_v25, %v64_v5  ;;  %v109_v31 = vsub.f32 %v107_v27, %v78_v25 }
 0x161   :  { %v178_v29 = vpop.eup %177 }
 0x162   :  { %v80_v30 = vmul.f32 0.6931472, %v178_v29  ;;  %v87_v32 = vmul.f32 128.0, %v85_v28  ;;  %v84_v36 = vpop.xlane.xlu0 %83  ;;  %v113_v37 = vmul.f32 0.8992126, %v109_v31 }
 0x164   :  { %v89_v34 = vsub.f32 %v82_v26, %v87_v32  ;;  %v86_v35 = vadd.f32 %v80_v30, %v66_v8  ;;  %v110_v38 = vsub.f32 %v108_v33, %v80_v30 }
 0x166   :  { %v111_v39 = vmul.f32 0.0007874016, %v89_v34  ;;  %v88_v40 = vmul.f32 128.0, %v86_v35  ;;  %v114_v43 = vmul.f32 0.8992126, %v110_v38 }
 0x168   :  { %v115_v41 = vadd.f32 %v113_v37, %v111_v39  ;;  %v90_v42 = vsub.f32 %v84_v36, %v88_v40 }
 0x16a   :  { %v117_v44 = vsub.f32 0.0, %v115_v41  ;;  %v112_v46 = vmul.f32 0.0007874016, %v90_v42 }
 0x16c   :  { %v121_v47 = vsel %vm119_vm3, 0.0, %v117_v44  ;;  %v116_v48 = vadd.f32 %v114_v43, %v112_v46 }
 0x16d   :  { %v125_v49 = vadd.f32 %v123_v45, %v121_v47 }
 0x16e   :  { %v118_v50 = vsub.f32 0.0, %v116_v48 }
 0x16f   :  { %128 = vst.msk [vmem:[#allocation2] sm:$0xff] %vm56_vm2, %v125_v49 }
 0x170   :  { %v122_v52 = vsel %vm120_vm4, 0.0, %v118_v50 }
 0x171   :  { %v126_v53 = vadd.f32 %v124_v51, %v122_v52 }
 0x173   :  { %129 = vst.msk [vmem:[#allocation2 + $0x8] sm:$0xff] %vm56_vm2, %v126_v53 }
 0x176   :  { %v133_v54 = vld [vmem:[#allocation2] sm:$0xff] }
 0x177   :  { %v135_v56 = vsel %vm56_vm2, %v133_v54, 0.0 }
 0x17a   :  { %v134_v55 = vld [vmem:[#allocation2 + $0x8] sm:$0xff] }
 0x17b   :  { %v136_v57 = vsel %vm56_vm2, %v134_v55, 0.0 }
 0x17c   :  { %v137_v58 = vadd.f32 %v136_v57, %v135_v56 }
 0x17e   :  { %v138_v59 = vrot.slane %v137_v58, 4 }
 0x180   :  { %v139_v60 = vadd.f32 %v138_v59, %v137_v58 }
 0x182   :  { %v140_v61 = vrot.slane %v139_v60, 2 }
 0x184   :  { %v141_v62 = vadd.f32 %v140_v61, %v139_v60 }
 0x186   :  { %v142_v63 = vrot.slane %v141_v62, 1 }
 0x188   :  { %v143_v0 = vadd.f32 %v142_v63, %v141_v62 }
 0x18a   :  { %145 = vst.msk [vmem:[#allocation8] sm:$0x1] %vm144_vm5, %v143_v0 }
 0x18b   :  { %234 = shalt.err (!%p231_p6)
}
 0x18c   :  { %s235_s11 = scalar_lea.hbm %s325_s2, 16 }
 0x18d   :  { %p236_p7 = scmp.ne.s32.totalorder %s325_s2, %s235_s11  ;;  %p239_p8 = scmp.lt.u32.totalorder %s235_s11, %s325_s2 }
 0x18f   :  { %p241_p9 = pnand %p239_p8, %p236_p7 }
 0x191   :  { %244 = shalt.err (!%p241_p9)
}
 0x192   :  { %155 = dma.vmem_to_hbm [thread:$0]  %s153_s6, 16, %s325_s2, [#allocation5]  }
 0x193   :  { %249 = dma.done.wait [#allocation5], 16  }
 0x194   :  { %250 = vsyncadd [#allocation5], 4294967280 }
 0x195   :  { %159 = vsyncpa [#allocation4], 1 }
 0x196   :  { %160 = vsyncpa [#allocation7], 1 }
 0x197   :  { %161 = vsyncpa [#allocation5], 1 }

</bundles_post_ra>
